<compile_context>
chip_gen: v6e
topology: v6e:2x2x1
jax: 0.10.0
libtpu: 0.0.40
codegen_flags: <defaults>
</compile_context>

<pallas_src>
import jax
import jax.numpy as jnp
from jax.experimental import pallas as pl
from jax.experimental.pallas import tpu as pltpu


def _round_up(x, m):
    return ((x + m - 1) // m) * m


def _tpu_vmem_bytes():
    try:
        return int(pltpu.get_tpu_info().vmem_capacity_bytes)
    except Exception:
        return 64 << 20  # conservative (v7x per-core VMEM)


def _mxu_multiple():
    # v2-v5 MXUs are 128-wide; v6e/v7x are 256-wide.  Default to 256 (padding a
    # little extra on old chips is harmless).
    try:
        kind = jax.devices()[0].device_kind.lower()
        if any(t in kind for t in ("v2", "v3", "v4", "v5")):
            return 128
    except Exception:
        pass
    return 256


def _texture_shader_kernel(idx_ref, bary_ref, colors_ref, out_ref):
    # idx_ref:    (1, 1, TP)  int32, pix_to_face for k=0 (-1 => background)
    # bary_ref:   (1, 3, TP)  f32,   barycentric weights for k=0
    # colors_ref: (RC, FC)    bf16,  per-face vertex colors, row = v*C_grp + c
    # out_ref:    (1, C, TP)  f32,   resident across the face-chunk grid axis
    C = out_ref.shape[1]
    tp = out_ref.shape[2]
    rc, fc = colors_ref.shape
    c_grp = rc // 3

    f_step = pl.program_id(2)

    @pl.when(f_step == 0)
    def _():
        out_ref[0] = jnp.zeros((C, tp), out_ref.dtype)

    idx = idx_ref[0]                                          # (1, TP) int32
    lidx = idx - f_step * fc                                  # face idx within chunk
    face_iota = jax.lax.broadcasted_iota(jnp.int32, (fc, tp), 0)
    # One-hot over this face chunk, built directly in bf16 (halves the VMEM /
    # vreg footprint and the MXU push bandwidth).  Background (idx < 0) and
    # out-of-chunk faces match nothing -> all-zero column -> zero contribution.
    onehot = (face_iota == lidx).astype(jnp.bfloat16)         # (FC, TP)

    # MXU gather: (RC, FC) @ (FC, TP) -> (RC, TP), single bf16 pass, f32 accum.
    g = jnp.dot(colors_ref[...], onehot,
                preferred_element_type=jnp.float32)

    # Barycentric interpolation on the VPU.  Zero bary on background pixels so
    # NaN/Inf background bary can never reach the output.
    b = jnp.where(idx >= 0, bary_ref[0], 0.0)                 # (3, TP) f32
    acc = b[0:1, :] * g[0:C, :]
    acc = acc + b[1:2, :] * g[c_grp:c_grp + C, :]
    acc = acc + b[2:3, :] * g[2 * c_grp:2 * c_grp + C, :]
    out_ref[0] += acc.astype(out_ref.dtype)


def _texture_shader_xla(bary_coords, pix_to_face, face_vertex_colors):
    # Plain-XLA gather path for large meshes where the one-hot-over-F approach
    # would be O(F x pixels) in VPU work and VMEM.
    # TODO(synk): replace with a scalar-prefetched per-tile visible-face-list
    # Pallas kernel for very large meshes.
    K = bary_coords.shape[3]
    C = face_vertex_colors.shape[2]
    idx0 = pix_to_face[..., 0]
    bary0 = bary_coords[..., 0, :].astype(jnp.float32)
    mask = idx0 >= 0
    tv = face_vertex_colors.astype(jnp.float32)[jnp.where(mask, idx0, 0)]  # (N,H,W,3,C)
    bary0 = jnp.where(mask[..., None], bary0, 0.0)
    img = jnp.einsum("nhwv,nhwvc->nhwc", bary0, tv)
    if K > 1 and C == 1:
        img = img[..., 0]
    return img


def texture_shader(bary_coords, pix_to_face, face_vertex_colors, *,
                   tile_p=16384, face_gather_threshold=4096, channels_last=True):
    """bary_coords: (N,H,W,K,3) f32; pix_to_face: (N,H,W,K) i32 (-1 = background);
    face_vertex_colors: (F,3,C).  Returns images per TextureShader.forward.
    channels_last=False skips the final NCHW->NHWC transpose (kernel-native layout)."""
    N, H, W, K, V = bary_coords.shape
    F, V2, C = face_vertex_colors.shape
    assert V == 3 and V2 == 3
    P = H * W

    if F > face_gather_threshold:
        return _texture_shader_xla(bary_coords, pix_to_face, face_vertex_colors)

    # Only face slot k = 0 ever reaches the output -> slice K away here.
    idx0 = pix_to_face[..., 0].reshape(N, 1, P).astype(jnp.int32)        # (N,1,P)
    bary0 = (bary_coords[..., 0, :].astype(jnp.float32)
             .reshape(N, P, 3).transpose(0, 2, 1))                       # (N,3,P)

    # --- Face-axis chunking (bounds the one-hot to <= f_chunk rows per step) ---
    mxu = _mxu_multiple()
    f_chunk_cap = 1024                       # multiple of both 128 and 256
    if F <= f_chunk_cap:
        F_pad = _round_up(F, mxu)
        f_chunk = F_pad
    else:
        f_chunk = f_chunk_cap
        F_pad = _round_up(F, f_chunk)

    # --- Pixel tile sized against a per-generation VMEM budget ---
    vmem_cap = _tpu_vmem_bytes()             # 128 MiB v5e/v6e, 64 MiB v7x
    vmem_limit = int(min(vmem_cap * 3 // 4, 100 << 20))
    # Budget ~half the scoped VMEM for the (f_chunk, tile) iota/compare/one-hot
    # working set (~6 B/elem: i32 iota + bf16 one-hot).
    tile_cap = max(128, ((vmem_limit // 2) // (f_chunk * 6)) // 128 * 128)
    tile = min(tile_p, tile_cap, _round_up(P, 128))
    tile = max(128, (tile // 128) * 128)
    # v7x has 2 TensorCores: make sure the parallel grid has >= 2 steps.
    while N * ((P + tile - 1) // tile) < 2 and tile > 128:
        tile = max(128, ((tile // 2) // 128) * 128)
    Pp = _round_up(P, tile)

    if Pp != P:
        idx0 = jnp.pad(idx0, ((0, 0), (0, 0), (0, Pp - P)), constant_values=-1)
        bary0 = jnp.pad(bary0, ((0, 0), (0, 0), (0, Pp - P)))

    # Face-color table: rows grouped per vertex on 8-sublane boundaries
    # (row = v*C_grp + c), pre-cast to bf16 for a single-pass MXU gather.
    C_grp = _round_up(C, 8)
    RC = 3 * C_grp
    ct = jnp.transpose(face_vertex_colors.astype(jnp.float32), (1, 2, 0))   # (3, C, F)
    ct = jnp.pad(ct, ((0, 0), (0, C_grp - C), (0, F_pad - F)))              # (3, C_grp, F_pad)
    colors_t = ct.reshape(RC, F_pad).astype(jnp.bfloat16)                   # (RC, F_pad)

    grid = (Pp // tile, N, F_pad // f_chunk)   # face chunks (reduction) last
    out = pl.pallas_call(
        _texture_shader_kernel,
        out_shape=jax.ShapeDtypeStruct((N, C, Pp), jnp.float32),
        grid=grid,
        in_specs=[
            pl.BlockSpec((1, 1, tile), lambda p, n, f: (n, 0, p)),
            pl.BlockSpec((1, 3, tile), lambda p, n, f: (n, 0, p)),
            pl.BlockSpec((RC, f_chunk), lambda p, n, f: (0, f)),
        ],
        out_specs=pl.BlockSpec((1, C, tile), lambda p, n, f: (n, 0, p)),
        compiler_params=pltpu.CompilerParams(
            dimension_semantics=("parallel", "parallel", "arbitrary"),
            vmem_limit_bytes=vmem_limit),
    )(idx0, bary0, colors_t)

    out = out[:, :, :P].reshape(N, C, H, W)                    # (N,C,H,W)
    # Mirror torch.squeeze(colors, dim=3): after the K>1 slice, dim 3 is C and
    # is dropped only when it is size 1 (the K==1 slot was already collapsed).
    if not channels_last:
        return out[:, 0] if (K > 1 and C == 1) else out
    images = out.transpose(0, 2, 3, 1)                          # NHWC
    if K > 1 and C == 1:
        images = images[..., 0]
    return images


if __name__ == "__main__":
    key = jax.random.PRNGKey(0)
    N, H, W, K, C, F = 2, 16, 16, 2, 3, 10
    k1, k2, k3 = jax.random.split(key, 3)

    # fragments.bary_coords: rows sum to 1
    bw = jax.random.uniform(k1, (N, H, W, K, 3), jnp.float32) + 1e-3
    bary_coords = bw / jnp.sum(bw, axis=-1, keepdims=True)
    # fragments.pix_to_face: -1 marks background pixels
    pix_to_face = jax.random.randint(k2, (N, H, W, K), -1, F).astype(jnp.int32)
    # synthetic mesh texture: per-face, per-vertex colors
    face_vertex_colors = jax.random.uniform(k3, (F, 3, C), jnp.float32)

    images = texture_shader(bary_coords, pix_to_face, face_vertex_colors)
    images = jax.block_until_ready(images)

    # plain-JAX reference of the same forward pass
    mask = pix_to_face >= 0
    tv_ref = face_vertex_colors[jnp.where(mask, pix_to_face, 0)]
    texels = jnp.einsum("nhwkv,nhwkvc->nhwkc",
                        jnp.where(mask[..., None], bary_coords, 0.0), tv_ref)
    ref = texels[:, :, :, 0, :]

    assert images.shape == (N, H, W, C), images.shape
    # tolerance covers the bf16 color table / single-pass MXU gather
    err = float(jnp.max(jnp.abs(images - ref)))
    assert jnp.allclose(images, ref, atol=4e-3, rtol=0.0), err
    print("KERNEL_OK")
</pallas_src>

<mosaic_0001>
module attributes {stable_mosaic.version = 11 : i64} {
  func.func @_texture_shader_kernel(%arg0: i32, %arg1: i32, %arg2: i32, %arg3: memref<1x1x256xi32, #tpu.memory_space<vmem>>, %arg4: memref<1x3x256xf32, #tpu.memory_space<vmem>>, %arg5: memref<24x256xbf16, #tpu.memory_space<vmem>>, %arg6: memref<1x3x256xf32, #tpu.memory_space<vmem>>) attributes {dimension_semantics = [#tpu.dimension_semantics<parallel>, #tpu.dimension_semantics<parallel>, #tpu.dimension_semantics<arbitrary>], iteration_bounds = array<i64: 1, 2, 1>, scalar_prefetch = 0 : i64, scratch_operands = 0 : i64, tpu.core_type = #tpu.core_type<tc>, window_params = [{transform_indices = @transform_0, window_bounds = array<i64: 1, 1, 256>}, {transform_indices = @transform_1, window_bounds = array<i64: 1, 3, 256>}, {transform_indices = @transform_2, window_bounds = array<i64: 24, 256>}, {transform_indices = @transform_3, window_bounds = array<i64: 1, 3, 256>}]} {
    %c0_i32 = arith.constant 0 : i32
    %0 = arith.cmpi eq, %arg2, %c0_i32 : i32
    %1 = arith.extui %0 : i1 to i32
    %c0_i32_0 = arith.constant 0 : i32
    %2 = arith.cmpi ne, %1, %c0_i32_0 : i32
    scf.if %2 {
      %cst_16 = arith.constant 0.000000e+00 : f32
      %44 = vector.broadcast %cst_16 : f32 to vector<3x256xf32>
      %c0_17 = arith.constant 0 : index
      %c0_18 = arith.constant 0 : index
      %c0_19 = arith.constant 0 : index
      %45 = vector.load %arg6[%c0_17, %c0_18, %c0_19] : memref<1x3x256xf32, #tpu.memory_space<vmem>>, vector<1x3x256xf32>
      %46 = vector.shape_cast %45 : vector<1x3x256xf32> to vector<3x256xf32>
      %47 = vector.shape_cast %44 : vector<3x256xf32> to vector<1x3x256xf32>
      tpu.vector_store %arg6[%c0_17, %c0_18, %c0_19], %47 {strides = array<i32>} : memref<1x3x256xf32, #tpu.memory_space<vmem>>, vector<1x3x256xf32>,
    } else {
    }
    %c0 = arith.constant 0 : index
    %c0_1 = arith.constant 0 : index
    %c0_2 = arith.constant 0 : index
    %3 = vector.load %arg3[%c0, %c0_1, %c0_2] : memref<1x1x256xi32, #tpu.memory_space<vmem>>, vector<1x1x256xi32>
    %4 = vector.shape_cast %3 : vector<1x1x256xi32> to vector<1x256xi32>
    %c256_i32 = arith.constant 256 : i32
    %5 = arith.muli %arg2, %c256_i32 : i32
    %6 = vector.broadcast %5 : i32 to vector<1x256xi32>
    %7 = arith.subi %4, %6 : vector<1x256xi32>
    %8 = tpu.iota {dimensions = array<i32: 0>} : vector<256x256xi32>
    %9 = vector.broadcast %7 : vector<1x256xi32> to vector<256x256xi32>
    %10 = arith.cmpi eq, %8, %9 : vector<256x256xi32>
    %11 = arith.extui %10 : vector<256x256xi1> to vector<256x256xi32>
    %12 = arith.sitofp %11 : vector<256x256xi32> to vector<256x256xf32>
    %13 = arith.truncf %12 : vector<256x256xf32> to vector<256x256xbf16>
    %c0_3 = arith.constant 0 : index
    %c0_4 = arith.constant 0 : index
    %14 = vector.load %arg5[%c0_3, %c0_4] : memref<24x256xbf16, #tpu.memory_space<vmem>>, vector<24x256xbf16>
    %cst = arith.constant dense<0.000000e+00> : vector<24x256xf32>
    %15 = tpu.matmul %14, %13, %cst {dimension_numbers = #tpu.dot_dimension_numbers<[1], [0], [0], [1], [0, 0, 1, 1], [], []>} : vector<24x256xbf16>, vector<256x256xbf16>, vector<24x256xf32> -> vector<24x256xf32>
    %c0_i32_5 = arith.constant 0 : i32
    %16 = vector.broadcast %c0_i32_5 : i32 to vector<1x256xi32>
    %17 = arith.cmpi sge, %4, %16 : vector<1x256xi32>
    %c0_6 = arith.constant 0 : index
    %c0_7 = arith.constant 0 : index
    %c0_8 = arith.constant 0 : index
    %18 = vector.load %arg4[%c0_6, %c0_7, %c0_8] : memref<1x3x256xf32, #tpu.memory_space<vmem>>, vector<1x3x256xf32>
    %19 = vector.shape_cast %18 : vector<1x3x256xf32> to vector<3x256xf32>
    %cst_9 = arith.constant 0.000000e+00 : f32
    %20 = vector.shape_cast %17 : vector<1x256xi1> to vector<1x256xi1>
    %21 = vector.broadcast %20 : vector<1x256xi1> to vector<3x256xi1>
    %22 = vector.broadcast %cst_9 : f32 to vector<3x256xf32>
    %23 = arith.select %21, %19, %22 : vector<3x256xi1>, vector<3x256xf32>
    %24 = vector.extract_strided_slice %23 {offsets = [0, 0], sizes = [1, 256], strides = [1, 1]} : vector<3x256xf32> to vector<1x256xf32>
    %25 = vector.extract_strided_slice %15 {offsets = [0, 0], sizes = [3, 256], strides = [1, 1]} : vector<24x256xf32> to vector<3x256xf32>
    %26 = vector.broadcast %24 : vector<1x256xf32> to vector<3x256xf32>
    %27 = arith.mulf %26, %25 : vector<3x256xf32>
    %28 = vector.extract_strided_slice %23 {offsets = [1, 0], sizes = [1, 256], strides = [1, 1]} : vector<3x256xf32> to vector<1x256xf32>
    %29 = vector.extract_strided_slice %15 {offsets = [8, 0], sizes = [3, 256], strides = [1, 1]} : vector<24x256xf32> to vector<3x256xf32>
    %30 = vector.broadcast %28 : vector<1x256xf32> to vector<3x256xf32>
    %31 = arith.mulf %30, %29 : vector<3x256xf32>
    %32 = arith.addf %27, %31 : vector<3x256xf32>
    %33 = vector.extract_strided_slice %23 {offsets = [2, 0], sizes = [1, 256], strides = [1, 1]} : vector<3x256xf32> to vector<1x256xf32>
    %34 = vector.extract_strided_slice %15 {offsets = [16, 0], sizes = [3, 256], strides = [1, 1]} : vector<24x256xf32> to vector<3x256xf32>
    %35 = vector.broadcast %33 : vector<1x256xf32> to vector<3x256xf32>
    %36 = arith.mulf %35, %34 : vector<3x256xf32>
    %37 = arith.addf %32, %36 : vector<3x256xf32>
    %c0_10 = arith.constant 0 : index
    %c0_11 = arith.constant 0 : index
    %c0_12 = arith.constant 0 : index
    %38 = vector.load %arg6[%c0_10, %c0_11, %c0_12] : memref<1x3x256xf32, #tpu.memory_space<vmem>>, vector<1x3x256xf32>
    %39 = vector.shape_cast %38 : vector<1x3x256xf32> to vector<3x256xf32>
    %40 = arith.addf %39, %37 : vector<3x256xf32>
    %c0_13 = arith.constant 0 : index
    %c0_14 = arith.constant 0 : index
    %c0_15 = arith.constant 0 : index
    %41 = vector.load %arg6[%c0_13, %c0_14, %c0_15] : memref<1x3x256xf32, #tpu.memory_space<vmem>>, vector<1x3x256xf32>
    %42 = vector.shape_cast %41 : vector<1x3x256xf32> to vector<3x256xf32>
    %43 = vector.shape_cast %40 : vector<3x256xf32> to vector<1x3x256xf32>
    tpu.vector_store %arg6[%c0_13, %c0_14, %c0_15], %43 {strides = array<i32>} : memref<1x3x256xf32, #tpu.memory_space<vmem>>, vector<1x3x256xf32>,
    return
  }
  func.func @transform_0(%arg0: i32, %arg1: i32, %arg2: i32) -> (i32, i32, i32) {
    %c0_i32 = arith.constant 0 : i32
    %c0_i32_0 = arith.constant 0 : i32
    return %arg1, %c0_i32, %arg0 : i32, i32, i32
  }
  func.func @transform_1(%arg0: i32, %arg1: i32, %arg2: i32) -> (i32, i32, i32) {
    %c0_i32 = arith.constant 0 : i32
    %c0_i32_0 = arith.constant 0 : i32
    return %arg1, %c0_i32, %arg0 : i32, i32, i32
  }
  func.func @transform_2(%arg0: i32, %arg1: i32, %arg2: i32) -> (i32, i32) {
    %c0_i32 = arith.constant 0 : i32
    %c0_i32_0 = arith.constant 0 : i32
    return %c0_i32, %arg2 : i32, i32
  }
  func.func @transform_3(%arg0: i32, %arg1: i32, %arg2: i32) -> (i32, i32, i32) {
    %c0_i32 = arith.constant 0 : i32
    %c0_i32_0 = arith.constant 0 : i32
    return %arg1, %c0_i32, %arg0 : i32, i32, i32
  }
}

</mosaic_0001>

<bundles_post_ra>
// kernel: tpu_custom_call.1
= control target key start
LH: loop header
LB: loop body
LE: loop exit
PB: predicated region body
PF: predicated region fallthrough
CT: control target
= control target key end

     0   :  { %s1055_s12 = smov 0   ;;  %s1057_s13 = smov 0   ;;  %s1308_s0 = inlined_call_operand.vmem [shape: s32[2,1,256], index: 0, kind: input, shape index: {}]   ;;  %s1309_s1 = inlined_call_operand.vmem [shape: f32[2,3,256], index: 1, kind: input, shape index: {}]   ;;  %s1310_s2 = inlined_call_operand.vmem [shape: bf16[24,256], index: 2, kind: input, shape index: {}]   ;;  %s1311_s3 = inlined_call_operand.vmem [shape: f32[2,3,256], index: 3, kind: output, shape index: {}]  }
   0x1   :  { %s1059_s14 = smov 0  }
   0x2 LB: > { %s28_s15 = sadd.s32 1, %s1026_s13  ;;  %p801_p0 = scmp.ge.s32.totalorder %s1030_s14, 1  ;;  %s1030_s14 = sphi %s1059_s14, %s13_s14   ;;  %s1026_s13 = sphi %s1057_s13, %s1313_s13   ;;  %s1022_s12 = sphi %s1055_s12, %s1312_s12  }
   0x3   : > { %p30_p1 = scmp.ge.s32.totalorder %s28_s15, 2  ;;  %p192_p2 = scmp.lt.s32.totalorder %s1030_s14, 3 }
   0x5   : > { %s1315_s15 = smov (%p30_p1, %s28_s15), 0  ;;  %p193_p3 = pnand %p801_p0, %p192_p2 }
   0x6   : > { %p238_p4 = scmp.lt.s32.totalorder (!%p193_p3), %s1022_s12, 1 }
   0x7   : > { %196 = sbr.rel (%p193_p3) target bundleno = 296 (0x128), region = 32 }
   0xc   : > { %v281_v0 = vlaneseq  ;;  %v1076_v1 = vld [vmem:[%s1310_s2 + $0x10] sm:$0xff]  ;;  %v1004_v2 = vld [vmem:[%s1310_s2 + $0x4] ss:$8 sps:$4 sm:$0xff]   ;;  %s1317_s12 = smov (!%p238_p4, %s1022_s12), 1  ;;  %v1032_v16 = vmov 0.0   ;;  %v1034_v45 = vmov 0  }
   0xd   : > { %v874_v3 = vcombine.high %v1076_v1, %v1076_v1  ;;  %598 = vmatprep.mubr.bf16.mxu0 %v1004_v2  ;;  %s802_s20 = sshll.u32 %s1317_s12, 1  ;;  %s941_s24 = sshll.u32 %s1317_s12, 3  ;;  %v1033_v17 = vmov 1.0|1.0   ;;  %v1002_v43 = vld [vmem:[%s1310_s2] ss:$8 sps:$4 sm:$0xff]   ;;  %v873_v44 = vcombine.low %v1076_v1, %v1076_v1 }
   0xe   : > { %v1085_v4 = vshrl.u32 %v281_v0, 7  ;;  %s244_s23 = scalar_lea.vmem %s1308_s0, %s802_s20  ;;  %s1109_s27 = scalar_lea.vmem %s1311_s3, %s941_s24 }
   0xf   : > { %608 = vmatprep.mubr.bf16.mxu1 %v874_v3  ;;  %v1100_v9 = vld [vmem:[%s244_s23] sm:$0x3]  ;;  %276 = vst [vmem:[%s1109_s27] sm:$0x77] %v1032_v16  ;;  %s254_s5 = scalar_lea.vmem %s1309_s1, %s941_s24 }
  0x10   : > { %v1089_v5 = vsub.s32 1, %v1085_v4  ;;  %v1092_v6 = vsub.s32 0, %v1085_v4  ;;  %v296_v7 = vadd.s32 112, %v1085_v4  ;;  %v297_v8 = vadd.s32 120, %v1085_v4  ;;  %v618_v48 = vld [vmem:[%s254_s5] sm:$0x77] }
  0x11   : > { %v294_v10 = vadd.s32 96, %v1085_v4  ;;  %v295_v11 = vadd.s32 104, %v1085_v4  ;;  %v292_v14 = vadd.s32 80, %v1085_v4  ;;  %v293_v15 = vadd.s32 88, %v1085_v4 }
  0x12   : > { %v1113_v12 = vrot.slane %v1100_v9, %v1089_v5  ;;  %v1117_v13 = vrot.slane %v1100_v9, %v1092_v6  ;;  %v290_v18 = vadd.s32 64, %v1085_v4  ;;  %v291_v19 = vadd.s32 72, %v1085_v4 }
  0x13   : > { %v288_v20 = vadd.s32 48, %v1085_v4  ;;  %v289_v21 = vadd.s32 56, %v1085_v4  ;;  %v286_v22 = vadd.s32 32, %v1085_v4  ;;  %v287_v23 = vadd.s32 40, %v1085_v4 }
  0x14   : > { %vm351_vm0 = vcmp.eq.s32.totalorder %v296_v7, %v1113_v12  ;;  %vm353_vm1 = vcmp.eq.s32.totalorder %v297_v8, %v1113_v12  ;;  %vm350_vm2 = vcmp.eq.s32.totalorder %v296_v7, %v1117_v13  ;;  %vm352_vm3 = vcmp.eq.s32.totalorder %v297_v8, %v1117_v13 }
  0x15   : > { %vm875_vm4 = vmpackc.low %vm353_vm1, %vm351_vm0  ;;  %vm347_vm5 = vcmp.eq.s32.totalorder %v294_v10, %v1113_v12  ;;  %vm349_vm6 = vcmp.eq.s32.totalorder %v295_v11, %v1113_v12  ;;  %vm346_vm7 = vcmp.eq.s32.totalorder %v294_v10, %v1117_v13  ;;  %vm348_vm8 = vcmp.eq.s32.totalorder %v295_v11, %v1117_v13 }
  0x16   : > { %876 = vmatprep.subr.msk.bf16.mxu0 %vm875_vm4, %v1033_v17  ;;  %943 = vmatprep.subr.msk.bf16.mxu1 %vm875_vm4, %v1033_v17  ;;  %vm877_vm9 = vmpackc.low %vm352_vm3, %vm350_vm2  ;;  %vm343_vm10 = vcmp.eq.s32.totalorder %v292_v14, %v1113_v12  ;;  %vm345_vm11 = vcmp.eq.s32.totalorder %v293_v15, %v1113_v12  ;;  %vm342_vm15 = vcmp.eq.s32.totalorder %v292_v14, %v1117_v13  ;;  %v284_v24 = vadd.s32 16, %v1085_v4 }
  0x17   : > { %878 = vmatpush1.bf16.msk.msra.mxu0 %vm877_vm9, %v1033_v17  ;;  %959 = vmatpush1.bf16.msk.msra.mxu1 %vm877_vm9, %v1033_v17  ;;  %vm879_vm12 = vmpackc.low %vm349_vm6, %vm347_vm5  ;;  %vm344_vm0 = vcmp.eq.s32.totalorder %v293_v15, %v1117_v13  ;;  %vm339_vm1 = vcmp.eq.s32.totalorder %v290_v18, %v1113_v12  ;;  %vm341_vm2 = vcmp.eq.s32.totalorder %v291_v19, %v1113_v12  ;;  %v285_v25 = vadd.s32 24, %v1085_v4 }
  0x18   : > { %880 = vmatprep.subr.msk.bf16.mxu0 %vm879_vm12, %v1033_v17  ;;  %944 = vmatprep.subr.msk.bf16.mxu1 %vm879_vm12, %v1033_v17  ;;  %vm881_vm13 = vmpackc.low %vm348_vm8, %vm346_vm7  ;;  %vm338_vm5 = vcmp.eq.s32.totalorder %v290_v18, %v1117_v13  ;;  %vm340_vm6 = vcmp.eq.s32.totalorder %v291_v19, %v1117_v13  ;;  %vm335_vm7 = vcmp.eq.s32.totalorder %v288_v20, %v1113_v12  ;;  %v283_v26 = vadd.s32 8, %v1085_v4 }
  0x19   : > { %vm883_vm14 = vmpackc.low %vm345_vm11, %vm343_vm10  ;;  %vm337_vm8 = vcmp.eq.s32.totalorder %v289_v21, %v1113_v12  ;;  %vm334_vm11 = vcmp.eq.s32.totalorder %v288_v20, %v1117_v13  ;;  %vm336_vm12 = vcmp.eq.s32.totalorder %v289_v21, %v1117_v13  ;;  %v312_v27 = vadd.s32 240, %v1085_v4 }
  0x1a   : > { %vm885_vm3 = vmpackc.low %vm344_vm0, %vm342_vm15  ;;  %v313_v28 = vadd.s32 248, %v1085_v4  ;;  %v310_v29 = vadd.s32 224, %v1085_v4  ;;  %v311_v30 = vadd.s32 232, %v1085_v4  ;;  %v308_v31 = vadd.s32 208, %v1085_v4 }
  0x1b   : > { %882 = vmatpush1.bf16.msk.msra.mxu0 %vm881_vm13, %v1033_v17  ;;  %960 = vmatpush1.bf16.msk.msra.mxu1 %vm881_vm13, %v1033_v17  ;;  %vm887_vm4 = vmpackc.low %vm341_vm2, %vm339_vm1  ;;  %vm331_vm13 = vcmp.eq.s32.totalorder %v286_v22, %v1113_v12  ;;  %vm330_vm1 = vcmp.eq.s32.totalorder %v286_v22, %v1117_v13  ;;  %vm332_vm2 = vcmp.eq.s32.totalorder %v287_v23, %v1117_v13  ;;  %v309_v32 = vadd.s32 216, %v1085_v4 }
  0x1c   : > { %884 = vmatprep.subr.msk.bf16.mxu0 %vm883_vm14, %v1033_v17  ;;  %945 = vmatprep.subr.msk.bf16.mxu1 %vm883_vm14, %v1033_v17  ;;  %vm889_vm9 = vmpackc.low %vm340_vm6, %vm338_vm5  ;;  %vm333_vm14 = vcmp.eq.s32.totalorder %v287_v23, %v1113_v12  ;;  %v306_v33 = vadd.s32 192, %v1085_v4  ;;  %v307_v34 = vadd.s32 200, %v1085_v4  ;;  %v304_v35 = vadd.s32 176, %v1085_v4 }
  0x1d   : > { %vm891_vm10 = vmpackc.low %vm337_vm8, %vm335_vm7  ;;  %vm326_vm7 = vcmp.eq.s32.totalorder %v284_v24, %v1117_v13  ;;  %vm328_vm8 = vcmp.eq.s32.totalorder %v285_v25, %v1117_v13  ;;  %v305_v36 = vadd.s32 184, %v1085_v4  ;;  %v302_v37 = vadd.s32 160, %v1085_v4 }
  0x1e   : > { %vm893_vm15 = vmpackc.low %vm336_vm12, %vm334_vm11  ;;  %v303_v38 = vadd.s32 168, %v1085_v4  ;;  %v300_v39 = vadd.s32 144, %v1085_v4  ;;  %v301_v40 = vadd.s32 152, %v1085_v4  ;;  %v298_v41 = vadd.s32 128, %v1085_v4 }
  0x1f   : > { %886 = vmatpush1.bf16.msk.msra.mxu0 %vm885_vm3, %v1033_v17  ;;  %961 = vmatpush1.bf16.msk.msra.mxu1 %vm885_vm3, %v1033_v17  ;;  %vm895_vm0 = vmpackc.low %vm333_vm14, %vm331_vm13  ;;  %vm327_vm3 = vcmp.eq.s32.totalorder %v284_v24, %v1113_v12  ;;  %vm322_vm13 = vcmp.eq.s32.totalorder %v1085_v4, %v1117_v13  ;;  %vm324_vm14 = vcmp.eq.s32.totalorder %v283_v26, %v1117_v13  ;;  %v299_v42 = vadd.s32 136, %v1085_v4 }
  0x20   : > { %888 = vmatprep.subr.msk.bf16.mxu0 %vm887_vm4, %v1033_v17  ;;  %946 = vmatprep.subr.msk.bf16.mxu1 %vm887_vm4, %v1033_v17  ;;  %vm329_vm4 = vcmp.eq.s32.totalorder %v285_v25, %v1113_v12  ;;  %vm897_vm5 = vmpackc.low %vm332_vm2, %vm330_vm1  ;;  %v631_v50 = vcombine.high %v618_v48, %v618_v48  ;;  %v659_v52 = vsub.s32 2, %v1085_v4 }
  0x21   : > { %vm899_vm6 = vmpackc.low %vm329_vm4, %vm327_vm3  ;;  %vm382_vm3 = vcmp.eq.s32.totalorder %v312_v27, %v1117_v13  ;;  %vm384_vm4 = vcmp.eq.s32.totalorder %v313_v28, %v1117_v13 }
  0x22   : > { %vm901_vm11 = vmpackc.low %vm328_vm8, %vm326_vm7 }
  0x23   : > { %890 = vmatpush1.bf16.msk.msra.mxu0 %vm889_vm9, %v1033_v17  ;;  %962 = vmatpush1.bf16.msk.msra.mxu1 %vm889_vm9, %v1033_v17  ;;  %vm323_vm9 = vcmp.eq.s32.totalorder %v1085_v4, %v1113_v12  ;;  %vm905_vm1 = vmpackc.low %vm324_vm14, %vm322_vm13 }
  0x24   : > { %892 = vmatprep.subr.msk.bf16.mxu0 %vm891_vm10, %v1033_v17  ;;  %947 = vmatprep.subr.msk.bf16.mxu1 %vm891_vm10, %v1033_v17  ;;  %vm325_vm10 = vcmp.eq.s32.totalorder %v283_v26, %v1113_v12  ;;  %vm909_vm7 = vmpackc.low %vm384_vm4, %vm382_vm3 }
  0x25   : > { %vm903_vm12 = vmpackc.low %vm325_vm10, %vm323_vm9  ;;  %vm378_vm9 = vcmp.eq.s32.totalorder %v310_v29, %v1117_v13  ;;  %vm380_vm10 = vcmp.eq.s32.totalorder %v311_v30, %v1117_v13 }
  0x26   : > { %vm913_vm13 = vmpackc.low %vm380_vm10, %vm378_vm9 }
  0x27   : > { %894 = vmatpush1.bf16.msk.msra.mxu0 %vm893_vm15, %v1033_v17  ;;  %963 = vmatpush1.bf16.msk.msra.mxu1 %vm893_vm15, %v1033_v17  ;;  %vm383_vm15 = vcmp.eq.s32.totalorder %v312_v27, %v1113_v12 }
  0x28   : > { %896 = vmatprep.subr.msk.bf16.mxu0 %vm895_vm0, %v1033_v17  ;;  %948 = vmatprep.subr.msk.bf16.mxu1 %vm895_vm0, %v1033_v17  ;;  %vm385_vm0 = vcmp.eq.s32.totalorder %v313_v28, %v1113_v12 }
  0x29   : > { %vm907_vm2 = vmpackc.low %vm385_vm0, %vm383_vm15  ;;  %vm374_vm15 = vcmp.eq.s32.totalorder %v308_v31, %v1117_v13  ;;  %vm376_vm0 = vcmp.eq.s32.totalorder %v309_v32, %v1117_v13 }
  0x2a   : > { %vm917_vm3 = vmpackc.low %vm376_vm0, %vm374_vm15 }
  0x2b   : > { %898 = vmatpush1.bf16.msk.msra.mxu0 %vm897_vm5, %v1033_v17  ;;  %964 = vmatpush1.bf16.msk.msra.mxu1 %vm897_vm5, %v1033_v17  ;;  %vm379_vm5 = vcmp.eq.s32.totalorder %v310_v29, %v1113_v12 }
  0x2c   : > { %900 = vmatprep.subr.msk.bf16.mxu0 %vm899_vm6, %v1033_v17  ;;  %949 = vmatprep.subr.msk.bf16.mxu1 %vm899_vm6, %v1033_v17  ;;  %vm381_vm6 = vcmp.eq.s32.totalorder %v311_v30, %v1113_v12 }
  0x2d   : > { %vm911_vm8 = vmpackc.low %vm381_vm6, %vm379_vm5  ;;  %vm370_vm5 = vcmp.eq.s32.totalorder %v306_v33, %v1117_v13  ;;  %vm372_vm6 = vcmp.eq.s32.totalorder %v307_v34, %v1117_v13 }
  0x2e   : > { %vm921_vm9 = vmpackc.low %vm372_vm6, %vm370_vm5 }
  0x2f   : > { %902 = vmatpush1.bf16.msk.msra.mxu0 %vm901_vm11, %v1033_v17  ;;  %965 = vmatpush1.bf16.msk.msra.mxu1 %vm901_vm11, %v1033_v17  ;;  %vm375_vm11 = vcmp.eq.s32.totalorder %v308_v31, %v1113_v12 }
  0x30   : > { %904 = vmatprep.subr.msk.bf16.mxu0 %vm903_vm12, %v1033_v17  ;;  %950 = vmatprep.subr.msk.bf16.mxu1 %vm903_vm12, %v1033_v17  ;;  %vm377_vm12 = vcmp.eq.s32.totalorder %v309_v32, %v1113_v12 }
  0x31   : > { %vm915_vm14 = vmpackc.low %vm377_vm12, %vm375_vm11  ;;  %vm366_vm11 = vcmp.eq.s32.totalorder %v304_v35, %v1117_v13  ;;  %vm368_vm12 = vcmp.eq.s32.totalorder %v305_v36, %v1117_v13 }
  0x32   : > { %vm925_vm15 = vmpackc.low %vm368_vm12, %vm366_vm11 }
  0x33   : > { %906 = vmatpush1.bf16.msk.msra.mxu0 %vm905_vm1, %v1033_v17  ;;  %966 = vmatpush1.bf16.msk.msra.mxu1 %vm905_vm1, %v1033_v17  ;;  %vm371_vm1 = vcmp.eq.s32.totalorder %v306_v33, %v1113_v12 }
  0x34   : > { %908 = vmatprep.subr.msk.bf16.mxu0 %vm907_vm2, %v1033_v17  ;;  %951 = vmatprep.subr.msk.bf16.mxu1 %vm907_vm2, %v1033_v17  ;;  %vm373_vm2 = vcmp.eq.s32.totalorder %v307_v34, %v1113_v12 }
  0x35   : > { %vm919_vm4 = vmpackc.low %vm373_vm2, %vm371_vm1  ;;  %vm362_vm1 = vcmp.eq.s32.totalorder %v302_v37, %v1117_v13  ;;  %vm364_vm2 = vcmp.eq.s32.totalorder %v303_v38, %v1117_v13 }
  0x36   : > { %vm929_vm5 = vmpackc.low %vm364_vm2, %vm362_vm1 }
  0x37   : > { %910 = vmatpush2.bf16.msk.msra.mxu0 %vm909_vm7, %v1033_v17  ;;  %967 = vmatpush2.bf16.msk.msra.mxu1 %vm909_vm7, %v1033_v17  ;;  %vm367_vm7 = vcmp.eq.s32.totalorder %v304_v35, %v1113_v12 }
  0x38   : > { %912 = vmatprep.subr.msk.bf16.mxu0 %vm911_vm8, %v1033_v17  ;;  %952 = vmatprep.subr.msk.bf16.mxu1 %vm911_vm8, %v1033_v17  ;;  %vm369_vm8 = vcmp.eq.s32.totalorder %v305_v36, %v1113_v12 }
  0x39   : > { %vm923_vm10 = vmpackc.low %vm369_vm8, %vm367_vm7  ;;  %vm358_vm7 = vcmp.eq.s32.totalorder %v300_v39, %v1117_v13  ;;  %vm360_vm8 = vcmp.eq.s32.totalorder %v301_v40, %v1117_v13 }
  0x3a   : > { %vm933_vm11 = vmpackc.low %vm360_vm8, %vm358_vm7 }
  0x3b   : > { %914 = vmatpush2.bf16.msk.msra.mxu0 %vm913_vm13, %v1033_v17  ;;  %968 = vmatpush2.bf16.msk.msra.mxu1 %vm913_vm13, %v1033_v17  ;;  %vm363_vm13 = vcmp.eq.s32.totalorder %v302_v37, %v1113_v12 }
  0x3c   : > { %916 = vmatprep.subr.msk.bf16.mxu0 %vm915_vm14, %v1033_v17  ;;  %953 = vmatprep.subr.msk.bf16.mxu1 %vm915_vm14, %v1033_v17  ;;  %vm365_vm14 = vcmp.eq.s32.totalorder %v303_v38, %v1113_v12 }
  0x3d   : > { %vm927_vm0 = vmpackc.low %vm365_vm14, %vm363_vm13  ;;  %vm354_vm13 = vcmp.eq.s32.totalorder %v298_v41, %v1117_v13  ;;  %vm356_vm14 = vcmp.eq.s32.totalorder %v299_v42, %v1117_v13 }
  0x3f   : > { %918 = vmatpush2.bf16.msk.msra.mxu0 %vm917_vm3, %v1033_v17  ;;  %969 = vmatpush2.bf16.msk.msra.mxu1 %vm917_vm3, %v1033_v17  ;;  %vm359_vm3 = vcmp.eq.s32.totalorder %v300_v39, %v1113_v12 }
  0x40   : > { %920 = vmatprep.subr.msk.bf16.mxu0 %vm919_vm4, %v1033_v17  ;;  %954 = vmatprep.subr.msk.bf16.mxu1 %vm919_vm4, %v1033_v17  ;;  %vm361_vm4 = vcmp.eq.s32.totalorder %v301_v40, %v1113_v12 }
  0x41   : > { %vm931_vm6 = vmpackc.low %vm361_vm4, %vm359_vm3 }
  0x43   : > { %922 = vmatpush2.bf16.msk.msra.mxu0 %vm921_vm9, %v1033_v17  ;;  %970 = vmatpush2.bf16.msk.msra.mxu1 %vm921_vm9, %v1033_v17  ;;  %vm355_vm9 = vcmp.eq.s32.totalorder %v298_v41, %v1113_v12 }
  0x44   : > { %924 = vmatprep.subr.msk.bf16.mxu0 %vm923_vm10, %v1033_v17  ;;  %955 = vmatprep.subr.msk.bf16.mxu1 %vm923_vm10, %v1033_v17  ;;  %vm357_vm10 = vcmp.eq.s32.totalorder %v299_v42, %v1113_v12 }
  0x45   : > { %vm935_vm12 = vmpackc.low %vm357_vm10, %vm355_vm9 }
  0x47   : > { %926 = vmatpush2.bf16.msk.msra.mxu0 %vm925_vm15, %v1033_v17  ;;  %971 = vmatpush2.bf16.msk.msra.mxu1 %vm925_vm15, %v1033_v17  ;;  %vm937_vm15 = vmpackc.low %vm356_vm14, %vm354_vm13 }
  0x48   : > { %928 = vmatprep.subr.msk.bf16.mxu0 %vm927_vm0, %v1033_v17  ;;  %956 = vmatprep.subr.msk.bf16.mxu1 %vm927_vm0, %v1033_v17  ;;  %vm617_vm0 = vcmp.ge.s32.totalorder %v1100_v9, 0 }
  0x49   : > { %v619_v46 = vsel %vm617_vm0, 1, %v1034_v45 }
  0x4a   : > { %v623_v47 = vrot.slane %v619_v46, %v1092_v6  ;;  %v627_v49 = vrot.slane %v619_v46, %v1089_v5 }
  0x4b   : > { %930 = vmatpush2.bf16.msk.msra.mxu0 %vm929_vm5, %v1033_v17  ;;  %972 = vmatpush2.bf16.msk.msra.mxu1 %vm929_vm5, %v1033_v17 }
  0x4c   : > { %932 = vmatprep.subr.msk.bf16.mxu0 %vm931_vm6, %v1033_v17  ;;  %957 = vmatprep.subr.msk.bf16.mxu1 %vm931_vm6, %v1033_v17  ;;  %vm628_vm1 = vcmp.eq.s32.totalorder %v623_v47, 1  ;;  %vm629_vm2 = vcmp.eq.s32.totalorder %v627_v49, 1 }
  0x4d   : > { %v633_v51 = vsel %vm628_vm1, %v618_v48, 0.0  ;;  %v634_v55 = vsel %vm629_vm2, %v631_v50, 0.0 }
  0x4e   : > { %v638_v56 = vrot.slane %v633_v51, %v1092_v6  ;;  %v648_v57 = vrot.slane %v633_v51, %v1089_v5  ;;  %v660_v60 = vrot.slane %v633_v51, %v659_v52  ;;  %v642_v61 = vrot.slane %v634_v55, %v1092_v6  ;;  %v669_v6 = vld [vmem:[%s1109_s27] sm:$0x77] }
  0x4f   : > { %934 = vmatpush2.bf16.msk.msra.mxu0 %vm933_vm11, %v1033_v17  ;;  %973 = vmatpush2.bf16.msk.msra.mxu1 %vm933_vm11, %v1033_v17  ;;  %v652_v62 = vrot.slane %v634_v55, %v1089_v5  ;;  %v664_v2 = vrot.slane %v634_v55, %v659_v52 }
  0x50   : > { %936 = vmatprep.subr.msk.bf16.mxu0 %vm935_vm12, %v1033_v17  ;;  %958 = vmatprep.subr.msk.bf16.mxu1 %vm935_vm12, %v1033_v17 }
  0x53   : > { %938 = vmatpush2.bf16.msk.msra.mxu0 %vm937_vm15, %v1033_v17  ;;  %974 = vmatpush2.bf16.msk.msra.mxu1 %vm937_vm15, %v1033_v17 }
  0x56   : > { %599 = vmatmul.mubr.bf16.vlgmr.msra.gmra.mxu0 %v1002_v43  ;;  %609 = vmatmul.mubr.bf16.vlgmr.msra.gmra.mxu1 %v873_v44 }
 0x116   : > { %v600_v53 = vpop.f32.mrf.mxu0  ;;  %v610_v54 = vpop.f32.mrf.mxu1 }
 0x117   : > { %v643_v1 = vmul.f32 %v638_v56, %v600_v53  ;;  %v665_v8 = vmul.f32 %v660_v60, %v610_v54 }
 0x118   : > { %v602_v58 = vpop.f32.mrf.mxu0  ;;  %v612_v59 = vpop.f32.mrf.mxu1 }
 0x119   : > { %v644_v9 = vmul.f32 %v642_v61, %v602_v58  ;;  %v666_v12 = vmul.f32 %v664_v2, %v612_v59 }
 0x11a   : > { %v604_v63 = vpop.f32.mrf.mxu0  ;;  %v614_v0 = vpop.f32.mrf.mxu1 }
 0x11b   : > { %v653_v3 = vmul.f32 %v648_v57, %v604_v63 }
 0x11c   : > { %v606_v4 = vpop.f32.mrf.mxu0  ;;  %v615_v7 = vpop.f32.mrf.mxu1 }
 0x11d   : > { %v655_v10 = vadd.f32 %v653_v3, %v643_v1  ;;  %v654_v11 = vmul.f32 %v652_v62, %v606_v4 }
 0x11f   : > { %v656_v13 = vadd.f32 %v654_v11, %v644_v9  ;;  %v667_v14 = vadd.f32 %v665_v8, %v655_v10 }
 0x121   : > { %v668_v15 = vadd.f32 %v666_v12, %v656_v13 }
 0x123   : > { %v672_v16 = vcombine.low %v667_v14, %v668_v15 }
 0x125   : > { %v674_v5 = vadd.f32 %v672_v16, %v669_v6 }
 0x127   : > { %675 = vst [vmem:[%s1109_s27] sm:$0x77] %v674_v5 }
 0x128 PF: > { %s13_s14 = sadd.s32 1, %s1030_s14   ;;  %s1312_s12 = smov %s1026_s13 }
 0x129   : > { %p10_p5 = scmp.ge.s32.totalorder %s13_s14, 4   ;;  %s1313_s13 = smov %s1315_s15 }
 0x12b   :  { %12 = sbr.rel (!%p10_p5) target bundleno = 2 (0x2), region = 72 }

</bundles_post_ra>
